<compile_context>
chip_gen: v7x
topology: tpu7x:2x2x1
jax: 0.10.0
libtpu: 0.0.40
codegen_flags: <defaults>
</compile_context>

<pallas_src>
import jax
import jax.numpy as jnp
from jax.experimental import pallas as pl
from jax.experimental.pallas import tpu as pltpu


def _round_up(n, m):
    return ((n + m - 1) // m) * m


def _cdiv(a, b):
    return (a + b - 1) // b


# --------------------------------------------------------------------------
# Kernel: one batch tile -> fused (Linear + ReLU) encoder + LinearProbe.
# --------------------------------------------------------------------------
def _probe_kernel(x_ref, we_ref, be_ref, wp_ref, bp_ref, o_ref):
    # x arrives in f32 straight from HBM; cast to MXU-native bf16 here
    # (saves the wrapper-side pad/cast pass over x).  f32 accumulation.
    x = x_ref[...].astype(jnp.bfloat16)
    h = jnp.dot(x, we_ref[...], preferred_element_type=jnp.float32)
    h = jnp.maximum(h + be_ref[...], 0.0)                 # bias + ReLU in f32
    logits = jnp.dot(h.astype(jnp.bfloat16), wp_ref[...],
                     preferred_element_type=jnp.float32)
    o_ref[...] = (logits + bp_ref[...]).astype(o_ref.dtype)


# --------------------------------------------------------------------------
# One-time parameter preparation (hoisted out of the per-call path).
# --------------------------------------------------------------------------
def prepare_probe_params(w_enc, b_enc, w_prb, b_prb):
    """Pad/cast the parameters once.

    w_enc: [d_in, hidden], b_enc: [hidden], w_prb: [hidden, num_classes],
    b_prb: [num_classes].  hidden and num_classes are zero-padded to
    multiples of 128 (lane-dense tiles / unmasked stores).  Padded hidden
    units have zero weight AND zero bias, so ReLU emits exactly 0 there and
    the real logits are unchanged; padded classes are sliced off afterwards.
    """
    d_in, hidden = w_enc.shape
    n_cls = w_prb.shape[1]
    hid_p = _round_up(max(hidden, 128), 128)
    cls_p = _round_up(max(n_cls, 128), 128)

    we_p = jnp.zeros((d_in, hid_p), jnp.bfloat16).at[:, :hidden].set(
        w_enc.astype(jnp.bfloat16))
    be_p = jnp.zeros((1, hid_p), jnp.float32).at[0, :hidden].set(
        b_enc.astype(jnp.float32))
    wp_p = jnp.zeros((hid_p, cls_p), jnp.bfloat16).at[:hidden, :n_cls].set(
        w_prb.astype(jnp.bfloat16))
    bp_p = jnp.zeros((1, cls_p), jnp.float32).at[0, :n_cls].set(
        b_prb.astype(jnp.float32))
    return {"we": we_p, "be": be_p, "wp": wp_p, "bp": bp_p,
            "hidden": hidden, "num_classes": n_cls}


# --------------------------------------------------------------------------
# Wrapper.
# --------------------------------------------------------------------------
_VMEM_BUDGET = 48 * 1024 * 1024   # fits comfortably inside v7x's 64 MiB VMEM


def _footprint_bytes(tm, d_in, hid_p, cls_p):
    """Conservative VMEM footprint (assumes double-buffered weights)."""
    x_tile = 2 * tm * d_in * 4            # f32 x tile, double-buffered
    out_tile = 2 * tm * cls_p * 4         # f32 logits tile, double-buffered
    w_enc = 2 * d_in * hid_p * 2          # bf16
    w_prb = 2 * hid_p * cls_p * 2         # bf16
    biases = 2 * (hid_p + cls_p) * 4
    interm = tm * (d_in * 2 + hid_p * 6 + cls_p * 4)  # bf16 x, h f32+bf16, logits
    return x_tile + out_tile + w_enc + w_prb + biases + interm


def fully_supervised_linear_probe(x_nchw, params, *, tm_max=512):
    """Fused encoder(Linear+ReLU) + LinearProbe forward pass.

    x_nchw: [B, C, H, W] float32.  params: output of prepare_probe_params().
    Returns logits [B, num_classes] float32.
    """
    we_p, be_p, wp_p, bp_p = params["we"], params["be"], params["wp"], params["bp"]
    n_cls = params["num_classes"]

    B = x_nchw.shape[0]
    x_flat = x_nchw.reshape(B, -1).astype(jnp.float32)   # [B, C*H*W]
    d_in = x_flat.shape[1]
    if d_in != we_p.shape[0]:
        raise ValueError(f"encoder input dim mismatch: {d_in} vs {we_p.shape[0]}")
    hid_p = we_p.shape[1]
    cls_p = wp_p.shape[1]

    # ---- batch tiling -------------------------------------------------------
    # >= 2 grid steps when B > 8 (v7x megacore), minimal batch-row padding,
    # tile shrunk until the resident footprint fits the VMEM budget.
    b_pad8 = _round_up(max(B, 8), 8)
    min_tiles = 2 if b_pad8 > 8 else 1
    n_tiles = max(_cdiv(b_pad8, tm_max), min_tiles)
    tm = _round_up(_cdiv(b_pad8, n_tiles), 8)
    while _footprint_bytes(tm, d_in, hid_p, cls_p) > _VMEM_BUDGET and tm > 8:
        tm = max(8, _round_up(tm // 2, 8))
    n_tiles = _cdiv(b_pad8, tm)
    b_pad = n_tiles * tm

    # Only the (small) batch-row zero-pad is materialized; x itself is passed
    # through in f32 and cast to bf16 inside the kernel.
    x_p = x_flat if b_pad == B else jnp.pad(x_flat, ((0, b_pad - B), (0, 0)))

    fp = _footprint_bytes(tm, d_in, hid_p, cls_p)
    vmem_limit = int(min(max(fp * 3 // 2 + (1 << 20), 8 << 20), _VMEM_BUDGET))

    out_shape = jax.ShapeDtypeStruct((b_pad, cls_p), jnp.float32)

    def run(single_buffer_weights):
        if single_buffer_weights:
            def pinned(shape):
                # Grid-invariant operand: no double-buffering needed.
                return pl.BlockSpec(shape, lambda i: (0, 0),
                                    pipeline_mode=pl.Buffered(1))
        else:
            def pinned(shape):
                return pl.BlockSpec(shape, lambda i: (0, 0))

        grid_spec = pltpu.PrefetchScalarGridSpec(
            num_scalar_prefetch=0,
            grid=(n_tiles,),
            in_specs=[
                pl.BlockSpec((tm, d_in), lambda i: (i, 0)),   # x rows (f32)
                pinned((d_in, hid_p)),                        # W_enc   (bf16)
                pinned((1, hid_p)),                           # b_enc   (f32)
                pinned((hid_p, cls_p)),                       # W_probe (bf16)
                pinned((1, cls_p)),                           # b_probe (f32)
            ],
            out_specs=pl.BlockSpec((tm, cls_p), lambda i: (i, 0)),
        )
        return pl.pallas_call(
            _probe_kernel,
            out_shape=out_shape,
            grid_spec=grid_spec,
            compiler_params=pltpu.CompilerParams(
                dimension_semantics=("parallel",),
                vmem_limit_bytes=vmem_limit),
        )(x_p, we_p, be_p, wp_p, bp_p)

    try:
        out_p = run(single_buffer_weights=True)
    except Exception:
        # pipeline_mode=pl.Buffered(1) not supported on this jax version /
        # backend: fall back to default double-buffering (still correct).
        out_p = run(single_buffer_weights=False)

    # Slice padding back off: [B, num_classes]
    return out_p[:B, :n_cls]


# --------------------------------------------------------------------------
# Deterministic init matching nn.Linear defaults.
# --------------------------------------------------------------------------
def _init_linear(key, fan_in, fan_out):
    """nn.Linear default init: U(-1/sqrt(fan_in), 1/sqrt(fan_in)) for W and b.
    Returned W is already [fan_in, fan_out] (kernel layout)."""
    kw, kb = jax.random.split(key)
    bound = 1.0 / jnp.sqrt(jnp.float32(fan_in))
    w = jax.random.uniform(kw, (fan_in, fan_out), jnp.float32, -bound, bound)
    b = jax.random.uniform(kb, (fan_out,), jnp.float32, -bound, bound)
    return w, b


if __name__ == "__main__":
    key = jax.random.PRNGKey(0)
    k_x, k_enc, k_prb = jax.random.split(key, 3)

    # Small shapes consistent with the module's forward.
    B, C, H, W = 2, 4, 16, 16
    hidden_size = 32          # encoder.hidden_size
    num_classes = 255         # FullySupervisedLinearProbe default

    x = jax.random.normal(k_x, (B, C, H, W), jnp.float32)

    d_in = C * H * W
    w_enc, b_enc = _init_linear(k_enc, d_in, hidden_size)         # encoder Linear
    w_prb, b_prb = _init_linear(k_prb, hidden_size, num_classes)  # probe Linear

    # One-time parameter prep (padding + bf16 cast) outside the call path.
    params = prepare_probe_params(w_enc, b_enc, w_prb, b_prb)

    out = fully_supervised_linear_probe(x, params)
    out = jax.block_until_ready(out)

    # Pure-JAX reference with the same bf16-input / f32-accumulate math.
    x_flat = x.reshape(B, -1)
    h_ref = jnp.dot(x_flat.astype(jnp.bfloat16), w_enc.astype(jnp.bfloat16),
                    preferred_element_type=jnp.float32) + b_enc
    h_ref = jnp.maximum(h_ref, 0.0)
    ref = jnp.dot(h_ref.astype(jnp.bfloat16), w_prb.astype(jnp.bfloat16),
                  preferred_element_type=jnp.float32) + b_prb

    assert out.shape == (B, num_classes), out.shape
    assert jnp.allclose(out, ref, atol=1e-2, rtol=1e-2), "mismatch vs reference"
    print("KERNEL_OK")
</pallas_src>

<mosaic_0001>
module attributes {stable_mosaic.version = 11 : i64} {
  func.func @_probe_kernel(%arg0: i32, %arg1: memref<8x1024xf32, #tpu.memory_space<vmem>>, %arg2: memref<1024x128xbf16, #tpu.memory_space<vmem>>, %arg3: memref<1x128xf32, #tpu.memory_space<vmem>>, %arg4: memref<128x256xbf16, #tpu.memory_space<vmem>>, %arg5: memref<1x256xf32, #tpu.memory_space<vmem>>, %arg6: memref<8x256xf32, #tpu.memory_space<vmem>>) attributes {dimension_semantics = [#tpu.dimension_semantics<parallel>], iteration_bounds = array<i64: 1>, scalar_prefetch = 0 : i64, scratch_operands = 0 : i64, tpu.core_type = #tpu.core_type<tc>, window_params = [{transform_indices = @transform_0, window_bounds = array<i64: 8, 1024>}, {pipeline_mode = #tpu.pipeline_mode<synchronous>, transform_indices = @transform_1, window_bounds = array<i64: 1024, 128>}, {pipeline_mode = #tpu.pipeline_mode<synchronous>, transform_indices = @transform_2, window_bounds = array<i64: 1, 128>}, {pipeline_mode = #tpu.pipeline_mode<synchronous>, transform_indices = @transform_3, window_bounds = array<i64: 128, 256>}, {pipeline_mode = #tpu.pipeline_mode<synchronous>, transform_indices = @transform_4, window_bounds = array<i64: 1, 256>}, {transform_indices = @transform_5, window_bounds = array<i64: 8, 256>}]} {
    %c0 = arith.constant 0 : index
    %c0_0 = arith.constant 0 : index
    %0 = vector.load %arg1[%c0, %c0_0] : memref<8x1024xf32, #tpu.memory_space<vmem>>, vector<8x1024xf32>
    %1 = arith.truncf %0 : vector<8x1024xf32> to vector<8x1024xbf16>
    %c0_1 = arith.constant 0 : index
    %c0_2 = arith.constant 0 : index
    %2 = vector.load %arg2[%c0_1, %c0_2] : memref<1024x128xbf16, #tpu.memory_space<vmem>>, vector<1024x128xbf16>
    %cst = arith.constant dense<0.000000e+00> : vector<8x128xf32>
    %3 = tpu.matmul %1, %2, %cst {dimension_numbers = #tpu.dot_dimension_numbers<[1], [0], [0], [1], [0, 0, 1, 1], [], []>} : vector<8x1024xbf16>, vector<1024x128xbf16>, vector<8x128xf32> -> vector<8x128xf32>
    %c0_3 = arith.constant 0 : index
    %c0_4 = arith.constant 0 : index
    %4 = vector.load %arg3[%c0_3, %c0_4] : memref<1x128xf32, #tpu.memory_space<vmem>>, vector<1x128xf32>
    %5 = vector.broadcast %4 : vector<1x128xf32> to vector<8x128xf32>
    %6 = arith.addf %3, %5 : vector<8x128xf32>
    %cst_5 = arith.constant 0.000000e+00 : f32
    %7 = vector.broadcast %cst_5 : f32 to vector<8x128xf32>
    %8 = arith.maximumf %6, %7 : vector<8x128xf32>
    %9 = arith.truncf %8 : vector<8x128xf32> to vector<8x128xbf16>
    %c0_6 = arith.constant 0 : index
    %c0_7 = arith.constant 0 : index
    %10 = vector.load %arg4[%c0_6, %c0_7] : memref<128x256xbf16, #tpu.memory_space<vmem>>, vector<128x256xbf16>
    %cst_8 = arith.constant dense<0.000000e+00> : vector<8x256xf32>
    %11 = tpu.matmul %9, %10, %cst_8 {dimension_numbers = #tpu.dot_dimension_numbers<[1], [0], [0], [1], [0, 0, 1, 1], [], []>} : vector<8x128xbf16>, vector<128x256xbf16>, vector<8x256xf32> -> vector<8x256xf32>
    %c0_9 = arith.constant 0 : index
    %c0_10 = arith.constant 0 : index
    %12 = vector.load %arg5[%c0_9, %c0_10] : memref<1x256xf32, #tpu.memory_space<vmem>>, vector<1x256xf32>
    %13 = vector.broadcast %12 : vector<1x256xf32> to vector<8x256xf32>
    %14 = arith.addf %11, %13 : vector<8x256xf32>
    %c0_11 = arith.constant 0 : index
    %c0_12 = arith.constant 0 : index
    %15 = vector.load %arg6[%c0_11, %c0_12] : memref<8x256xf32, #tpu.memory_space<vmem>>, vector<8x256xf32>
    tpu.vector_store %arg6[%c0_11, %c0_12], %14 {strides = array<i32>} : memref<8x256xf32, #tpu.memory_space<vmem>>, vector<8x256xf32>,
    return
  }
  func.func @transform_0(%arg0: i32) -> (i32, i32) {
    %c0_i32 = arith.constant 0 : i32
    %c0_i32_0 = arith.constant 0 : i32
    return %arg0, %c0_i32 : i32, i32
  }
  func.func @transform_1(%arg0: i32) -> (i32, i32) {
    %c0_i32 = arith.constant 0 : i32
    %c0_i32_0 = arith.constant 0 : i32
    %c0_i32_1 = arith.constant 0 : i32
    return %c0_i32, %c0_i32_0 : i32, i32
  }
  func.func @transform_2(%arg0: i32) -> (i32, i32) {
    %c0_i32 = arith.constant 0 : i32
    %c0_i32_0 = arith.constant 0 : i32
    %c0_i32_1 = arith.constant 0 : i32
    return %c0_i32, %c0_i32_0 : i32, i32
  }
  func.func @transform_3(%arg0: i32) -> (i32, i32) {
    %c0_i32 = arith.constant 0 : i32
    %c0_i32_0 = arith.constant 0 : i32
    %c0_i32_1 = arith.constant 0 : i32
    return %c0_i32, %c0_i32_0 : i32, i32
  }
  func.func @transform_4(%arg0: i32) -> (i32, i32) {
    %c0_i32 = arith.constant 0 : i32
    %c0_i32_0 = arith.constant 0 : i32
    %c0_i32_1 = arith.constant 0 : i32
    return %c0_i32, %c0_i32_0 : i32, i32
  }
  func.func @transform_5(%arg0: i32) -> (i32, i32) {
    %c0_i32 = arith.constant 0 : i32
    %c0_i32_0 = arith.constant 0 : i32
    return %arg0, %c0_i32 : i32, i32
  }
}

module attributes {stable_mosaic.version = 11 : i64} {
  func.func @_probe_kernel(%arg0: i32, %arg1: memref<8x1024xf32, #tpu.memory_space<vmem>>, %arg2: memref<1024x128xbf16, #tpu.memory_space<vmem>>, %arg3: memref<1x128xf32, #tpu.memory_space<vmem>>, %arg4: memref<128x256xbf16, #tpu.memory_space<vmem>>, %arg5: memref<1x256xf32, #tpu.memory_space<vmem>>, %arg6: memref<8x256xf32, #tpu.memory_space<vmem>>) attributes {dimension_semantics = [#tpu.dimension_semantics<parallel>], iteration_bounds = array<i64: 1>, scalar_prefetch = 0 : i64, scratch_operands = 0 : i64, tpu.core_type = #tpu.core_type<tc>, window_params = [{transform_indices = @transform_0, window_bounds = array<i64: 8, 1024>}, {pipeline_mode = #tpu.pipeline_mode<synchronous>, transform_indices = @transform_1, window_bounds = array<i64: 1024, 128>}, {pipeline_mode = #tpu.pipeline_mode<synchronous>, transform_indices = @transform_2, window_bounds = array<i64: 1, 128>}, {pipeline_mode = #tpu.pipeline_mode<synchronous>, transform_indices = @transform_3, window_bounds = array<i64: 128, 256>}, {pipeline_mode = #tpu.pipeline_mode<synchronous>, transform_indices = @transform_4, window_bounds = array<i64: 1, 256>}, {transform_indices = @transform_5, window_bounds = array<i64: 8, 256>}]} {
    %c0 = arith.constant 0 : index
    %c0_0 = arith.constant 0 : index
    %0 = vector.load %arg1[%c0, %c0_0] : memref<8x1024xf32, #tpu.memory_space<vmem>>, vector<8x1024xf32>
    %1 = arith.truncf %0 : vector<8x1024xf32> to vector<8x1024xbf16>
    %c0_1 = arith.constant 0 : index
    %c0_2 = arith.constant 0 : index
    %2 = vector.load %arg2[%c0_1, %c0_2] : memref<1024x128xbf16, #tpu.memory_space<vmem>>, vector<1024x128xbf16>
    %cst = arith.constant dense<0.000000e+00> : vector<8x128xf32>
    %3 = tpu.matmul %1, %2, %cst {dimension_numbers = #tpu.dot_dimension_numbers<[1], [0], [0], [1], [0, 0, 1, 1], [], []>} : vector<8x1024xbf16>, vector<1024x128xbf16>, vector<8x128xf32> -> vector<8x128xf32>
    %c0_3 = arith.constant 0 : index
    %c0_4 = arith.constant 0 : index
    %4 = vector.load %arg3[%c0_3, %c0_4] : memref<1x128xf32, #tpu.memory_space<vmem>>, vector<1x128xf32>
    %5 = vector.broadcast %4 : vector<1x128xf32> to vector<8x128xf32>
    %6 = arith.addf %3, %5 : vector<8x128xf32>
    %cst_5 = arith.constant 0.000000e+00 : f32
    %7 = vector.broadcast %cst_5 : f32 to vector<8x128xf32>
    %8 = arith.maximumf %6, %7 : vector<8x128xf32>
    %9 = arith.truncf %8 : vector<8x128xf32> to vector<8x128xbf16>
    %c0_6 = arith.constant 0 : index
    %c0_7 = arith.constant 0 : index
    %10 = vector.load %arg4[%c0_6, %c0_7] : memref<128x256xbf16, #tpu.memory_space<vmem>>, vector<128x256xbf16>
    %cst_8 = arith.constant dense<0.000000e+00> : vector<8x256xf32>
    %11 = tpu.matmul %9, %10, %cst_8 {dimension_numbers = #tpu.dot_dimension_numbers<[1], [0], [0], [1], [0, 0, 1, 1], [], []>} : vector<8x128xbf16>, vector<128x256xbf16>, vector<8x256xf32> -> vector<8x256xf32>
    %c0_9 = arith.constant 0 : index
    %c0_10 = arith.constant 0 : index
    %12 = vector.load %arg5[%c0_9, %c0_10] : memref<1x256xf32, #tpu.memory_space<vmem>>, vector<1x256xf32>
    %13 = vector.broadcast %12 : vector<1x256xf32> to vector<8x256xf32>
    %14 = arith.addf %11, %13 : vector<8x256xf32>
    %c0_11 = arith.constant 0 : index
    %c0_12 = arith.constant 0 : index
    %15 = vector.load %arg6[%c0_11, %c0_12] : memref<8x256xf32, #tpu.memory_space<vmem>>, vector<8x256xf32>
    tpu.vector_store %arg6[%c0_11, %c0_12], %14 {strides = array<i32>} : memref<8x256xf32, #tpu.memory_space<vmem>>, vector<8x256xf32>,
    return
  }
  func.func @transform_0(%arg0: i32) -> (i32, i32) {
    %c0_i32 = arith.constant 0 : i32
    %c0_i32_0 = arith.constant 0 : i32
    return %arg0, %c0_i32 : i32, i32
  }
  func.func @transform_1(%arg0: i32) -> (i32, i32) {
    %c0_i32 = arith.constant 0 : i32
    %c0_i32_0 = arith.constant 0 : i32
    %c0_i32_1 = arith.constant 0 : i32
    return %c0_i32, %c0_i32_0 : i32, i32
  }
  func.func @transform_2(%arg0: i32) -> (i32, i32) {
    %c0_i32 = arith.constant 0 : i32
    %c0_i32_0 = arith.constant 0 : i32
    %c0_i32_1 = arith.constant 0 : i32
    return %c0_i32, %c0_i32_0 : i32, i32
  }
  func.func @transform_3(%arg0: i32) -> (i32, i32) {
    %c0_i32 = arith.constant 0 : i32
    %c0_i32_0 = arith.constant 0 : i32
    %c0_i32_1 = arith.constant 0 : i32
    return %c0_i32, %c0_i32_0 : i32, i32
  }
  func.func @transform_4(%arg0: i32) -> (i32, i32) {
    %c0_i32 = arith.constant 0 : i32
    %c0_i32_0 = arith.constant 0 : i32
    %c0_i32_1 = arith.constant 0 : i32
    return %c0_i32, %c0_i32_0 : i32, i32
  }
  func.func @transform_5(%arg0: i32) -> (i32, i32) {
    %c0_i32 = arith.constant 0 : i32
    %c0_i32_0 = arith.constant 0 : i32
    return %arg0, %c0_i32 : i32, i32
  }
}

</mosaic_0001>

<bundles_post_ra>
// kernel: tpu_custom_call.1
= control target key start
LH: loop header
LB: loop body
LE: loop exit
PB: predicated region body
PF: predicated region fallthrough
CT: control target
= control target key end

     0   :  { %10 = vsyncpa [#allocation3], 0  ;;  %s1378_s0 = inlined_call_operand.hbm [shape: f32[8,1024], index: 0, kind: input, shape index: {}]   ;;  %s1379_s1 = inlined_call_operand.hbm [shape: bf16[1024,128], index: 1, kind: input, shape index: {}]   ;;  %s1380_s2 = inlined_call_operand.vmem [shape: f32[1,128], index: 2, kind: input, shape index: {}]   ;;  %s1381_s3 = inlined_call_operand.hbm [shape: bf16[128,256], index: 3, kind: input, shape index: {}]   ;;  %s1382_s4 = inlined_call_operand.vmem [shape: f32[1,256], index: 4, kind: input, shape index: {}]   ;;  %s1383_s5 = inlined_call_operand.hbm [shape: f32[8,256], index: 5, kind: output, shape index: {}]  }
   0x1   :  { %11 = vsyncpa [#allocation6], 0 }
   0x2   :  { %12 = vsyncpa [#allocation4], 0  ;;  %s1285_s18 = smov [#allocation5]   ;;  %s1191_s22 = scalar_lea.hbm %s1379_s1, 8192 }
   0x3   :  { %s28_s19 = sshll.u32 %s1285_s18, 4  ;;  %p1192_p0 = scmp.ne.s32.totalorder %s1379_s1, %s1191_s22  ;;  %s29_s19 = int_to_ptr.vmem [resolvable:$true] %s28_s19 }
   0x4   :  { %p1195_p1 = scmp.lt.u32.totalorder %s1191_s22, %s1379_s1 }
   0x6   :  { %p1197_p2 = pnand %p1195_p1, %p1192_p0 }
   0x8   :  { %1200 = shalt.err (!%p1197_p2)
}
   0x9   :  { %s1201_s27 = scalar_lea.vmem %s29_s19, 8192  ;;  %p1206_p4 = scmp.lt.s32.totalorder %s29_s19, %s29_s19 }
   0xa   :  { %p1202_p3 = scmp.ne.s32.totalorder %s29_s19, %s1201_s27  ;;  %p1207_p5 = scmp.lt.s32.totalorder %s1201_s27, %s1201_s27 }
   0xc   :  { %p1208_p6 = por %p1207_p5, %p1206_p4 }
   0xe   :  { %p1209_p7 = pnand %p1208_p6, %p1202_p3 }
  0x10   :  { %1212 = shalt.err (!%p1209_p7)
}
  0x11   :  { %s1286_s28 = smov 64   ;;  %s1287_s29 = smov 4  }
  0x12   :  { %34 = dma.hbm_to_vmem [thread:$0]  %s1379_s1, 8192, %s29_s19, [#allocation6], %s1286_s28, %s1286_s28, %s1287_s29  }
  0x13   :  { %s1288_s7 = smov [#allocation2]   ;;  %s1289_s9 = smov [#allocation7]  }
  0x14   :  { %s19_s8 = sshll.u32 %s1288_s7, 4  ;;  %s42_s10 = sshll.u32 %s1289_s9, 4  ;;  %s20_s8 = int_to_ptr.vmem [resolvable:$true] %s19_s8  ;;  %s43_s10 = int_to_ptr.vmem [resolvable:$true] %s42_s10 }
  0x15   :  { %s1213_s13 = scalar_lea.hbm %s1378_s0, 1024 }
  0x16   :  { %p1214_p8 = scmp.ne.s32.totalorder %s1378_s0, %s1213_s13  ;;  %p1217_p9 = scmp.lt.u32.totalorder %s1213_s13, %s1378_s0 }
  0x18   :  { %p1219_p10 = pnand %p1217_p9, %p1214_p8 }
  0x1a   :  { %1222 = shalt.err (!%p1219_p10)
}
  0x1b   :  { %s1223_s1 = scalar_lea.vmem %s20_s8, 1024  ;;  %p1228_p12 = scmp.lt.s32.totalorder %s20_s8, %s20_s8 }
  0x1c   :  { %p1224_p11 = scmp.ne.s32.totalorder %s20_s8, %s1223_s1  ;;  %p1229_p13 = scmp.lt.s32.totalorder %s1223_s1, %s1223_s1 }
  0x1e   :  { %p1230_p0 = por %p1229_p13, %p1228_p12 }
  0x20   :  { %p1231_p1 = pnand %p1230_p0, %p1224_p11 }
  0x22   :  { %1234 = shalt.err (!%p1231_p1)
}
  0x23   :  { %22 = dma.hbm_to_vmem [thread:$0]  %s1378_s0, 1024, %s20_s8, [#allocation3]  }
  0x24   :  { %s1235_s22 = scalar_lea.hbm %s1381_s3, 2048 }
  0x25   :  { %p1236_p2 = scmp.ne.s32.totalorder %s1381_s3, %s1235_s22  ;;  %p1239_p3 = scmp.lt.u32.totalorder %s1235_s22, %s1381_s3 }
  0x27   :  { %p1241_p4 = pnand %p1239_p3, %p1236_p2 }
  0x29   :  { %1244 = shalt.err (!%p1241_p4)
}
  0x2a   :  { %s1245_s27 = scalar_lea.vmem %s43_s10, 2048  ;;  %p1250_p6 = scmp.lt.s32.totalorder %s43_s10, %s43_s10 }
  0x2b   :  { %p1246_p5 = scmp.ne.s32.totalorder %s43_s10, %s1245_s27  ;;  %p1251_p7 = scmp.lt.s32.totalorder %s1245_s27, %s1245_s27 }
  0x2d   :  { %p1252_p8 = por %p1251_p7, %p1250_p6 }
  0x2f   :  { %p1253_p9 = pnand %p1252_p8, %p1246_p5 }
  0x31   :  { %1256 = shalt.err (!%p1253_p9)
}
  0x32   :  { %s1290_s0 = smov 128   ;;  %s1291_s28 = smov 8  }
  0x33   :  { %48 = dma.hbm_to_vmem [thread:$0]  %s1381_s3, 2048, %s43_s10, [#allocation6], %s1290_s0, %s1290_s0, %s1291_s28  }
  0x34   :  { %1279 = dma.done.wait [#allocation3], 1024  }
  0x35   :  { %1280 = vsyncadd [#allocation3], 4294966272 }
  0x36   :  { %1281 = dma.done.wait [#allocation6], 10240  }
  0x37   :  { %1282 = vsyncadd [#allocation6], 4294957056  ;;  %v1103_v0 = vld [vmem:[#allocation5 + $0x40] sm:$0xff]   ;;  %v1107_v4 = vld [vmem:[#allocation5 + $0x48] sm:$0xff]   ;;  %s1293_s8 = smov [#allocation8]  }
  0x38   :  { %v1104_v1 = vld [vmem:[#allocation5 + $0xc0] sm:$0xff]   ;;  %1006 = vmatprep.subr.bf16.mxu0 %v1103_v0  ;;  %v1108_v5 = vld [vmem:[#allocation5 + $0xc8] sm:$0xff]   ;;  %v1111_v8 = vld [vmem:[#allocation5 + $0x50] sm:$0xff]   ;;  %s915_s9 = sshll.u32 %s1293_s8, 4  ;;  %s916_s9 = int_to_ptr.vmem [resolvable:$true] %s915_s9 }
  0x39   :  { %v1105_v2 = vld [vmem:[#allocation5] sm:$0xff]   ;;  %1028 = vmatprep.subr.bf16.mxu1 %v1104_v1  ;;  %v1109_v6 = vld [vmem:[#allocation5 + $0x8] sm:$0xff]   ;;  %v1112_v9 = vld [vmem:[#allocation5 + $0xd0] sm:$0xff]   ;;  %s1257_s10 = scalar_lea.vmem %s916_s9, 256  ;;  %p1262_p11 = scmp.lt.s32.totalorder %s916_s9, %s916_s9 }
  0x3a   :  { %v1106_v3 = vld [vmem:[#allocation5 + $0x80] sm:$0xff]   ;;  %1007 = vmatpush3.bf16.msra.mxu0 %v1105_v2  ;;  %v1110_v7 = vld [vmem:[#allocation5 + $0x88] sm:$0xff]   ;;  %v1113_v10 = vld [vmem:[#allocation5 + $0x10] sm:$0xff]   ;;  %p1258_p10 = scmp.ne.s32.totalorder %s916_s9, %s1257_s10  ;;  %p1263_p12 = scmp.lt.s32.totalorder %s1257_s10, %s1257_s10 }
  0x3b   :  { %1029 = vmatpush3.bf16.msra.mxu1 %v1106_v3  ;;  %1008 = vmatprep.subr.bf16.mxu0 %v1107_v4  ;;  %v1114_v11 = vld [vmem:[#allocation5 + $0x90] sm:$0xff]   ;;  %v1115_v12 = vld [vmem:[#allocation5 + $0x58] sm:$0xff]   ;;  %v1119_v16 = vld [vmem:[#allocation5 + $0x60] sm:$0xff]  }
  0x3c   :  { %1030 = vmatprep.subr.bf16.mxu1 %v1108_v5  ;;  %v1116_v13 = vld [vmem:[#allocation5 + $0xd8] sm:$0xff]   ;;  %v1120_v17 = vld [vmem:[#allocation5 + $0xe0] sm:$0xff]   ;;  %v1123_v20 = vld [vmem:[#allocation5 + $0x68] sm:$0xff]   ;;  %p1264_p13 = por %p1263_p12, %p1262_p11 }
  0x3d   :  { %v1117_v14 = vld [vmem:[#allocation5 + $0x18] sm:$0xff]   ;;  %v1121_v18 = vld [vmem:[#allocation5 + $0x20] sm:$0xff]   ;;  %v1124_v21 = vld [vmem:[#allocation5 + $0xe8] sm:$0xff]  }
  0x3e   :  { %1009 = vmatpush3.bf16.msra.mxu0 %v1109_v6  ;;  %v1118_v15 = vld [vmem:[#allocation5 + $0x98] sm:$0xff]   ;;  %v1122_v19 = vld [vmem:[#allocation5 + $0xa0] sm:$0xff]   ;;  %v1125_v22 = vld [vmem:[#allocation5 + $0x28] sm:$0xff]   ;;  %p1265_p0 = pnand %p1264_p13, %p1258_p10 }
  0x3f   :  { %1031 = vmatpush3.bf16.msra.mxu1 %v1110_v7  ;;  %1010 = vmatprep.subr.bf16.mxu0 %v1111_v8  ;;  %v1126_v23 = vld [vmem:[#allocation5 + $0xa8] sm:$0xff]   ;;  %v1127_v24 = vld [vmem:[#allocation5 + $0x70] sm:$0xff]   ;;  %v1131_v28 = vld [vmem:[#allocation5 + $0x78] sm:$0xff]  }
  0x40   :  { %1032 = vmatprep.subr.bf16.mxu1 %v1112_v9  ;;  %v1128_v25 = vld [vmem:[#allocation5 + $0xf0] sm:$0xff]   ;;  %v1132_v29 = vld [vmem:[#allocation5 + $0xf8] sm:$0xff]   ;;  %v62_v32 = vld [vmem:[#allocation2 + $0x8] sm:$0xff] }
  0x41   :  { %v1129_v26 = vld [vmem:[#allocation5 + $0x30] sm:$0xff]   ;;  %v1133_v30 = vld [vmem:[#allocation5 + $0x38] sm:$0xff]   ;;  %v61_v34 = vld [vmem:[#allocation2] sm:$0xff]  ;;  %v70_v35 = vpack.c.bf16 %v62_v32, %v62_v32  ;;  %v1292_v32 = vmov 0  }
  0x42   :  { %1011 = vmatpush3.bf16.msra.mxu0 %v1113_v10  ;;  %v1130_v27 = vld [vmem:[#allocation5 + $0xb0] sm:$0xff]   ;;  %v1134_v31 = vld [vmem:[#allocation5 + $0xb8] sm:$0xff]   ;;  %v69_v37 = vpack.c.bf16 %v61_v34, %v61_v34  ;;  %v1135_v40 = vld [vmem:[#allocation5 + $0x140] sm:$0xff]  }
  0x43   :  { %1033 = vmatpush3.bf16.msra.mxu1 %v1114_v11  ;;  %1012 = vmatprep.subr.bf16.mxu0 %v1115_v12  ;;  %v64_v33 = vld [vmem:[#allocation2 + $0x18] sm:$0xff]  ;;  %v63_v38 = vld [vmem:[#allocation2 + $0x10] sm:$0xff]  ;;  %v1136_v41 = vld [vmem:[#allocation5 + $0x1c0] sm:$0xff]  }
  0x44   :  { %1034 = vmatprep.subr.bf16.mxu1 %v1116_v13  ;;  %v72_v36 = vpack.c.bf16 %v64_v33, %v64_v33  ;;  %v71_v39 = vpack.c.bf16 %v63_v38, %v63_v38  ;;  %628 = vmatprep.mubr.bf16.mxu0 %v70_v35  ;;  %v1137_v42 = vld [vmem:[#allocation5 + $0x100] sm:$0xff]   ;;  %v1139_v44 = vld [vmem:[#allocation5 + $0x148] sm:$0xff]   ;;  %v1143_v48 = vld [vmem:[#allocation5 + $0x150] sm:$0xff]  }
  0x45   :  { %v1138_v43 = vld [vmem:[#allocation5 + $0x180] sm:$0xff]   ;;  %v1140_v45 = vld [vmem:[#allocation5 + $0x1c8] sm:$0xff]   ;;  %v1144_v49 = vld [vmem:[#allocation5 + $0x1d0] sm:$0xff]  }
  0x46   :  { %1013 = vmatpush3.bf16.msra.mxu0 %v1117_v14  ;;  %668 = vmatprep.mubr.bf16.mxu1 %v72_v36  ;;  %v1141_v46 = vld [vmem:[#allocation5 + $0x108] sm:$0xff]   ;;  %v1145_v50 = vld [vmem:[#allocation5 + $0x110] sm:$0xff]   ;;  %v1147_v52 = vld [vmem:[#allocation5 + $0x158] sm:$0xff]  }
  0x47   :  { %1035 = vmatpush3.bf16.msra.mxu1 %v1118_v15  ;;  %1014 = vmatprep.subr.bf16.mxu0 %v1119_v16  ;;  %v1142_v47 = vld [vmem:[#allocation5 + $0x188] sm:$0xff]   ;;  %v1146_v51 = vld [vmem:[#allocation5 + $0x190] sm:$0xff]   ;;  %v1148_v53 = vld [vmem:[#allocation5 + $0x1d8] sm:$0xff]  }
  0x48   :  { %1036 = vmatprep.subr.bf16.mxu1 %v1120_v17  ;;  %v1149_v54 = vld [vmem:[#allocation5 + $0x118] sm:$0xff]   ;;  %v1151_v56 = vld [vmem:[#allocation5 + $0x160] sm:$0xff]   ;;  %v1155_v60 = vld [vmem:[#allocation5 + $0x168] sm:$0xff]  }
  0x49   :  { %v1150_v55 = vld [vmem:[#allocation5 + $0x198] sm:$0xff]   ;;  %v1152_v57 = vld [vmem:[#allocation5 + $0x1e0] sm:$0xff]   ;;  %v1156_v61 = vld [vmem:[#allocation5 + $0x1e8] sm:$0xff]  }
  0x4a   :  { %1015 = vmatpush3.bf16.msra.mxu0 %v1121_v18  ;;  %v1153_v58 = vld [vmem:[#allocation5 + $0x120] sm:$0xff]   ;;  %v1157_v62 = vld [vmem:[#allocation5 + $0x128] sm:$0xff]   ;;  %v1159_v0 = vld [vmem:[#allocation5 + $0x170] sm:$0xff]  }
  0x4b   :  { %1037 = vmatpush3.bf16.msra.mxu1 %v1122_v19  ;;  %1016 = vmatprep.subr.bf16.mxu0 %v1123_v20  ;;  %v1154_v59 = vld [vmem:[#allocation5 + $0x1a0] sm:$0xff]   ;;  %v1158_v63 = vld [vmem:[#allocation5 + $0x1a8] sm:$0xff]   ;;  %v1160_v1 = vld [vmem:[#allocation5 + $0x1f0] sm:$0xff]  }
  0x4c   :  { %1038 = vmatprep.subr.bf16.mxu1 %v1124_v21  ;;  %v1161_v2 = vld [vmem:[#allocation5 + $0x130] sm:$0xff]   ;;  %v1163_v4 = vld [vmem:[#allocation5 + $0x178] sm:$0xff]   ;;  %v66_v8 = vld [vmem:[#allocation2 + $0x28] sm:$0xff] }
  0x4d   :  { %v1162_v3 = vld [vmem:[#allocation5 + $0x1b0] sm:$0xff]   ;;  %v1164_v5 = vld [vmem:[#allocation5 + $0x1f8] sm:$0xff]   ;;  %v74_v10 = vpack.c.bf16 %v66_v8, %v66_v8  ;;  %v65_v12 = vld [vmem:[#allocation2 + $0x20] sm:$0xff] }
  0x4e   :  { %1017 = vmatpush3.bf16.msra.mxu0 %v1125_v22  ;;  %v1165_v6 = vld [vmem:[#allocation5 + $0x138] sm:$0xff]   ;;  %v67_v13 = vld [vmem:[#allocation2 + $0x30] sm:$0xff]  ;;  %v73_v14 = vpack.c.bf16 %v65_v12, %v65_v12  ;;  %v1167_v16 = vld [vmem:[#allocation7] ss:$8 sps:$4 sm:$0xff]  }
  0x4f   :  { %1039 = vmatpush3.bf16.msra.mxu1 %v1126_v23  ;;  %1018 = vmatprep.subr.bf16.mxu0 %v1127_v24  ;;  %v1166_v7 = vld [vmem:[#allocation5 + $0x1b8] sm:$0xff]   ;;  %v75_v15 = vpack.c.bf16 %v67_v13, %v67_v13  ;;  %v1169_v17 = vld [vmem:[#allocation7 + $0x4] ss:$8 sps:$4 sm:$0xff]   ;;  %v1173_v21 = vld [vmem:[#allocation7 + $0x20] ss:$8 sps:$4 sm:$0xff]  }
  0x50   :  { %1040 = vmatprep.subr.bf16.mxu1 %v1128_v25  ;;  %v68_v9 = vld [vmem:[#allocation2 + $0x38] sm:$0xff]  ;;  %v1175_v20 = vld [vmem:[#allocation7 + $0x24] ss:$8 sps:$4 sm:$0xff]   ;;  %v1179_v25 = vld [vmem:[#allocation7 + $0x40] ss:$8 sps:$4 sm:$0xff]  }
  0x51   :  { %v76_v11 = vpack.c.bf16 %v68_v9, %v68_v9  ;;  %v1172_v18 = vld [vmem:[#allocation7 + $0x14] ss:$8 sps:$4 sm:$0xff]   ;;  %v1170_v19 = vld [vmem:[#allocation7 + $0x10] ss:$8 sps:$4 sm:$0xff]   ;;  %v1181_v24 = vld [vmem:[#allocation7 + $0x44] ss:$8 sps:$4 sm:$0xff]  }
  0x52   :  { %1019 = vmatpush3.bf16.msra.mxu0 %v1129_v26  ;;  %v1178_v22 = vld [vmem:[#allocation7 + $0x34] ss:$8 sps:$4 sm:$0xff]   ;;  %v1176_v23 = vld [vmem:[#allocation7 + $0x30] ss:$8 sps:$4 sm:$0xff]   ;;  %v925_v35 = vld [vmem:[%s1380_s2] ss:$0 sm:$0xff] }
  0x53   :  { %1041 = vmatpush3.bf16.msra.mxu1 %v1130_v27  ;;  %1020 = vmatprep.subr.bf16.mxu0 %v1131_v28  ;;  %v1184_v26 = vld [vmem:[#allocation7 + $0x54] ss:$8 sps:$4 sm:$0xff]   ;;  %v1182_v27 = vld [vmem:[#allocation7 + $0x50] ss:$8 sps:$4 sm:$0xff]   ;;  %v1187_v28 = vld [vmem:[#allocation7 + $0x64] ss:$8 sps:$4 sm:$0xff]  }
  0x54   :  { %1042 = vmatprep.subr.bf16.mxu1 %v1132_v29  ;;  %v1185_v29 = vld [vmem:[#allocation7 + $0x60] ss:$8 sps:$4 sm:$0xff]  }
  0x56   :  { %1021 = vmatpush3.bf16.msra.mxu0 %v1133_v30  ;;  %v1190_v30 = vld [vmem:[#allocation7 + $0x74] ss:$8 sps:$4 sm:$0xff]  }
  0x57   :  { %1043 = vmatpush3.bf16.msra.mxu1 %v1134_v31  ;;  %1050 = vmatprep.subr.bf16.mxu0 %v1135_v40  ;;  %v1188_v31 = vld [vmem:[#allocation7 + $0x70] ss:$8 sps:$4 sm:$0xff]  }
  0x58   :  { %1072 = vmatprep.subr.bf16.mxu1 %v1136_v41 }
  0x59   :  { %629 = vmatmul.mubr.bf16.vlgmr.msra.gmra.mrb[0].mxu0 %v69_v37 }
  0x5a   :  { %669 = vmatmul.mubr.bf16.vlgmr.msra.gmra.mrb[0].mxu1 %v71_v39  ;;  %1051 = vmatpush3.bf16.msra.mxu0 %v1137_v42 }
  0x5b   :  { %1073 = vmatpush3.bf16.msra.mxu1 %v1138_v43  ;;  %1052 = vmatprep.subr.bf16.mxu0 %v1139_v44 }
  0x5c   :  { %1074 = vmatprep.subr.bf16.mxu1 %v1140_v45  ;;  %708 = vmatprep.mubr.bf16.mxu0 %v74_v10 }
  0x5d   :  { %748 = vmatprep.mubr.bf16.mxu1 %v76_v11 }
  0x5e   :  { %1053 = vmatpush3.bf16.msra.mxu0 %v1141_v46 }
  0x5f   :  { %1075 = vmatpush3.bf16.msra.mxu1 %v1142_v47  ;;  %1054 = vmatprep.subr.bf16.mxu0 %v1143_v48 }
  0x60   :  { %1076 = vmatprep.subr.bf16.mxu1 %v1144_v49 }
  0x62   :  { %1055 = vmatpush3.bf16.msra.mxu0 %v1145_v50 }
  0x63   :  { %1077 = vmatpush3.bf16.msra.mxu1 %v1146_v51  ;;  %1056 = vmatprep.subr.bf16.mxu0 %v1147_v52 }
  0x64   :  { %1078 = vmatprep.subr.bf16.mxu1 %v1148_v53 }
  0x66   :  { %1057 = vmatpush3.bf16.msra.mxu0 %v1149_v54 }
  0x67   :  { %1079 = vmatpush3.bf16.msra.mxu1 %v1150_v55  ;;  %1058 = vmatprep.subr.bf16.mxu0 %v1151_v56 }
  0x68   :  { %1080 = vmatprep.subr.bf16.mxu1 %v1152_v57 }
  0x6a   :  { %1059 = vmatpush3.bf16.msra.mxu0 %v1153_v58 }
  0x6b   :  { %1081 = vmatpush3.bf16.msra.mxu1 %v1154_v59  ;;  %1060 = vmatprep.subr.bf16.mxu0 %v1155_v60  ;;  %v776_v60 = vlaneseq }
  0x6c   :  { %1082 = vmatprep.subr.bf16.mxu1 %v1156_v61 }
  0x6d   :  { %v777_v61 = vshrl.u32 %v776_v60, 7 }
  0x6e   :  { %1061 = vmatpush3.bf16.msra.mxu0 %v1157_v62 }
  0x6f   :  { %1083 = vmatpush3.bf16.msra.mxu1 %v1158_v63  ;;  %1062 = vmatprep.subr.bf16.mxu0 %v1159_v0  ;;  %v778_v62 = vsub.s32 0, %v777_v61  ;;  %v774_v63 = vld [vmem:[%s1382_s4] sm:$0x3]  ;;  %v782_v0 = vsub.s32 1, %v777_v61 }
  0x70   :  { %1084 = vmatprep.subr.bf16.mxu1 %v1160_v1 }
  0x71   :  { %v779_v1 = vrot.slane %v774_v63, %v778_v62 }
  0x72   :  { %1063 = vmatpush3.bf16.msra.mxu0 %v1161_v2  ;;  %v783_v2 = vrot.slane %v774_v63, %v782_v0 }
  0x73   :  { %1085 = vmatpush3.bf16.msra.mxu1 %v1162_v3  ;;  %1064 = vmatprep.subr.bf16.mxu0 %v1163_v4 }
  0x74   :  { %1086 = vmatprep.subr.bf16.mxu1 %v1164_v5 }
  0x76   :  { %1065 = vmatpush3.bf16.msra.mxu0 %v1165_v6 }
  0x77   :  { %1087 = vmatpush3.bf16.msra.mxu1 %v1166_v7  ;;  %866 = vmatprep.subr.bf16.mxu0 %v1169_v17 }
  0x79   :  { %709 = vmatmul.mubr.bf16.vlgmr.msra.gmra.mrb[4].mxu0 %v73_v14 }
  0x7a   :  { %749 = vmatmul.mubr.bf16.vlgmr.msra.gmra.mrb[4].mxu1 %v75_v15  ;;  %867 = vmatpush1.bf16.msra.mxu0 %v1167_v16 }
  0x7b   :  { %868 = vmatprep.subr.bf16.mxu0 %v1172_v18  ;;  %898 = vmatprep.mubr.bf16.mxu0 %v1292_v32 }
  0x7e   :  { %869 = vmatpush1.bf16.msra.mxu0 %v1170_v19 }
  0x7f   :  { %870 = vmatprep.subr.bf16.mxu0 %v1175_v20 }
  0x82   :  { %871 = vmatpush1.bf16.msra.mxu0 %v1173_v21 }
  0x83   :  { %872 = vmatprep.subr.bf16.mxu0 %v1178_v22 }
  0x86   :  { %873 = vmatpush1.bf16.msra.mxu0 %v1176_v23 }
  0x87   :  { %874 = vmatprep.subr.bf16.mxu0 %v1181_v24 }
  0x8a   :  { %875 = vmatpush1.bf16.msra.mxu0 %v1179_v25 }
  0x8b   :  { %876 = vmatprep.subr.bf16.mxu0 %v1184_v26 }
  0x8e   :  { %877 = vmatpush1.bf16.msra.mxu0 %v1182_v27 }
  0x8f   :  { %878 = vmatprep.subr.bf16.mxu0 %v1187_v28 }
  0x92   :  { %879 = vmatpush1.bf16.msra.mxu0 %v1185_v29 }
  0x93   :  { %880 = vmatprep.subr.bf16.mxu0 %v1190_v30 }
  0x96   :  { %881 = vmatpush1.bf16.msra.mxu0 %v1188_v31 }
 0x12c   :  { %v1022_v33 = vpop.f32.mrb[0].mxu0 }
 0x12d   :  { %v1044_v34 = vpop.f32.mrb[0].mxu1  ;;  %v1023_v36 = vpop.f32.mrb[1].mxu0 }
 0x12e   :  { %v1045_v37 = vpop.f32.mrb[1].mxu1  ;;  %v1024_v38 = vadd.f32 %v1023_v36, %v1022_v33  ;;  %v1025_v40 = vpop.f32.mrb[2].mxu0 }
 0x12f   :  { %v1046_v39 = vadd.f32 %v1045_v37, %v1044_v34  ;;  %v1047_v41 = vpop.f32.mrb[2].mxu1  ;;  %v1026_v42 = vpop.f32.mrb[3].mxu0 }
 0x130   :  { %v1048_v43 = vpop.f32.mrb[3].mxu1  ;;  %v631_v44 = vadd.f32 %v1024_v38, %v925_v35 }
 0x132   :  { %v671_v45 = vadd.f32 %v1046_v39, %v631_v44 }
 0x14c   :  { %v1066_v46 = vpop.f32.mrb[4].mxu0 }
 0x14d   :  { %v1088_v47 = vpop.f32.mrb[4].mxu1  ;;  %v1067_v48 = vpop.f32.mrb[5].mxu0 }
 0x14e   :  { %v1068_v49 = vadd.f32 %v1067_v48, %v1066_v46  ;;  %v1089_v50 = vpop.f32.mrb[5].mxu1  ;;  %v1069_v51 = vpop.f32.mrb[6].mxu0 }
 0x14f   :  { %v1090_v52 = vadd.f32 %v1089_v50, %v1088_v47  ;;  %v1091_v53 = vpop.f32.mrb[6].mxu1  ;;  %v1070_v54 = vpop.f32.mrb[7].mxu0 }
 0x150   :  { %v711_v55 = vadd.f32 %v1068_v49, %v671_v45  ;;  %v1092_v56 = vpop.f32.mrb[7].mxu1 }
 0x152   :  { %v751_v57 = vadd.f32 %v1090_v52, %v711_v55 }
 0x154   :  { %v756_v58 = vmax.f32 %v751_v57, 0.0 }
 0x156   :  { %v757_v59 = vpack.c.bf16 %v756_v58, %v756_v58 }
 0x158   :  { %899 = vmatmul.mubr.bf16.vlgmr.msra.gmra.mrb[8].mxu0 %v757_v59 }
 0x22b   :  { %v900_v3 = vpop.f32.mrb[8].mxu0 }
 0x22c   :  { %v901_v4 = vadd.f32 %v900_v3, %v779_v1  ;;  %v902_v5 = vpop.f32.mrb[9].mxu0 }
 0x22d   :  { %v903_v6 = vadd.f32 %v902_v5, %v783_v2  ;;  %v904_v7 = vpop.f32.mrb[10].mxu0 }
 0x22e   :  { %907 = vst [vmem:[#allocation8] sm:$0xff] %v901_v4  ;;  %v905_v8 = vpop.f32.mrb[11].mxu0 }
 0x22f   :  { %908 = vst [vmem:[#allocation8 + $0x8] sm:$0xff] %v903_v6 }
 0x230   :  { %1268 = shalt.err (!%p1265_p0)
}
 0x231   :  { %s1269_s12 = scalar_lea.hbm %s1383_s5, 256 }
 0x232   :  { %p1270_p1 = scmp.ne.s32.totalorder %s1383_s5, %s1269_s12  ;;  %p1273_p2 = scmp.lt.u32.totalorder %s1269_s12, %s1383_s5 }
 0x234   :  { %p1275_p3 = pnand %p1273_p2, %p1270_p1 }
 0x236   :  { %1278 = shalt.err (!%p1275_p3)
}
 0x237   :  { %918 = dma.vmem_to_hbm [thread:$0]  %s916_s9, 256, %s1383_s5, [#allocation4]  }
 0x238   :  { %1283 = dma.done.wait [#allocation4], 256  }
 0x239   :  { %1284 = vsyncadd [#allocation4], 4294967040 }
 0x23a   :  { %922 = vsyncpa [#allocation3], 1 }
 0x23b   :  { %923 = vsyncpa [#allocation6], 1 }
 0x23c   :  { %924 = vsyncpa [#allocation4], 1 }

// kernel: tpu_custom_call.1
= control target key start
LH: loop header
LB: loop body
LE: loop exit
PB: predicated region body
PF: predicated region fallthrough
CT: control target
= control target key end

     0   :  { %10 = vsyncpa [#allocation3], 0  ;;  %s1378_s0 = inlined_call_operand.hbm [shape: f32[8,1024], index: 0, kind: input, shape index: {}]   ;;  %s1379_s1 = inlined_call_operand.hbm [shape: bf16[1024,128], index: 1, kind: input, shape index: {}]   ;;  %s1380_s2 = inlined_call_operand.vmem [shape: f32[1,128], index: 2, kind: input, shape index: {}]   ;;  %s1381_s3 = inlined_call_operand.hbm [shape: bf16[128,256], index: 3, kind: input, shape index: {}]   ;;  %s1382_s4 = inlined_call_operand.vmem [shape: f32[1,256], index: 4, kind: input, shape index: {}]   ;;  %s1383_s5 = inlined_call_operand.hbm [shape: f32[8,256], index: 5, kind: output, shape index: {}]  }
   0x1   :  { %11 = vsyncpa [#allocation6], 0 }
   0x2   :  { %12 = vsyncpa [#allocation4], 0  ;;  %s1285_s18 = smov [#allocation5]   ;;  %s1191_s22 = scalar_lea.hbm %s1379_s1, 8192 }
   0x3   :  { %s28_s19 = sshll.u32 %s1285_s18, 4  ;;  %p1192_p0 = scmp.ne.s32.totalorder %s1379_s1, %s1191_s22  ;;  %s29_s19 = int_to_ptr.vmem [resolvable:$true] %s28_s19 }
   0x4   :  { %p1195_p1 = scmp.lt.u32.totalorder %s1191_s22, %s1379_s1 }
   0x6   :  { %p1197_p2 = pnand %p1195_p1, %p1192_p0 }
   0x8   :  { %1200 = shalt.err (!%p1197_p2)
}
   0x9   :  { %s1201_s27 = scalar_lea.vmem %s29_s19, 8192  ;;  %p1206_p4 = scmp.lt.s32.totalorder %s29_s19, %s29_s19 }
   0xa   :  { %p1202_p3 = scmp.ne.s32.totalorder %s29_s19, %s1201_s27  ;;  %p1207_p5 = scmp.lt.s32.totalorder %s1201_s27, %s1201_s27 }
   0xc   :  { %p1208_p6 = por %p1207_p5, %p1206_p4 }
   0xe   :  { %p1209_p7 = pnand %p1208_p6, %p1202_p3 }
  0x10   :  { %1212 = shalt.err (!%p1209_p7)
}
  0x11   :  { %s1286_s28 = smov 64   ;;  %s1287_s29 = smov 4  }
  0x12   :  { %34 = dma.hbm_to_vmem [thread:$0]  %s1379_s1, 8192, %s29_s19, [#allocation6], %s1286_s28, %s1286_s28, %s1287_s29  }
  0x13   :  { %s1288_s7 = smov [#allocation2]   ;;  %s1289_s9 = smov [#allocation7]  }
  0x14   :  { %s19_s8 = sshll.u32 %s1288_s7, 4  ;;  %s42_s10 = sshll.u32 %s1289_s9, 4  ;;  %s20_s8 = int_to_ptr.vmem [resolvable:$true] %s19_s8  ;;  %s43_s10 = int_to_ptr.vmem [resolvable:$true] %s42_s10 }
  0x15   :  { %s1213_s13 = scalar_lea.hbm %s1378_s0, 1024 }
  0x16   :  { %p1214_p8 = scmp.ne.s32.totalorder %s1378_s0, %s1213_s13  ;;  %p1217_p9 = scmp.lt.u32.totalorder %s1213_s13, %s1378_s0 }
  0x18   :  { %p1219_p10 = pnand %p1217_p9, %p1214_p8 }
  0x1a   :  { %1222 = shalt.err (!%p1219_p10)
}
  0x1b   :  { %s1223_s1 = scalar_lea.vmem %s20_s8, 1024  ;;  %p1228_p12 = scmp.lt.s32.totalorder %s20_s8, %s20_s8 }
  0x1c   :  { %p1224_p11 = scmp.ne.s32.totalorder %s20_s8, %s1223_s1  ;;  %p1229_p13 = scmp.lt.s32.totalorder %s1223_s1, %s1223_s1 }
  0x1e   :  { %p1230_p0 = por %p1229_p13, %p1228_p12 }
  0x20   :  { %p1231_p1 = pnand %p1230_p0, %p1224_p11 }
  0x22   :  { %1234 = shalt.err (!%p1231_p1)
}
  0x23   :  { %22 = dma.hbm_to_vmem [thread:$0]  %s1378_s0, 1024, %s20_s8, [#allocation3]  }
  0x24   :  { %s1235_s22 = scalar_lea.hbm %s1381_s3, 2048 }
  0x25   :  { %p1236_p2 = scmp.ne.s32.totalorder %s1381_s3, %s1235_s22  ;;  %p1239_p3 = scmp.lt.u32.totalorder %s1235_s22, %s1381_s3 }
  0x27   :  { %p1241_p4 = pnand %p1239_p3, %p1236_p2 }
  0x29   :  { %1244 = shalt.err (!%p1241_p4)
}
  0x2a   :  { %s1245_s27 = scalar_lea.vmem %s43_s10, 2048  ;;  %p1250_p6 = scmp.lt.s32.totalorder %s43_s10, %s43_s10 }
  0x2b   :  { %p1246_p5 = scmp.ne.s32.totalorder %s43_s10, %s1245_s27  ;;  %p1251_p7 = scmp.lt.s32.totalorder %s1245_s27, %s1245_s27 }
  0x2d   :  { %p1252_p8 = por %p1251_p7, %p1250_p6 }
  0x2f   :  { %p1253_p9 = pnand %p1252_p8, %p1246_p5 }
  0x31   :  { %1256 = shalt.err (!%p1253_p9)
}
  0x32   :  { %s1290_s0 = smov 128   ;;  %s1291_s28 = smov 8  }
  0x33   :  { %48 = dma.hbm_to_vmem [thread:$0]  %s1381_s3, 2048, %s43_s10, [#allocation6], %s1290_s0, %s1290_s0, %s1291_s28  }
  0x34   :  { %1279 = dma.done.wait [#allocation3], 1024  }
  0x35   :  { %1280 = vsyncadd [#allocation3], 4294966272 }
  0x36   :  { %1281 = dma.done.wait [#allocation6], 10240  }
  0x37   :  { %1282 = vsyncadd [#allocation6], 4294957056  ;;  %v1103_v0 = vld [vmem:[#allocation5 + $0x40] sm:$0xff]   ;;  %v1107_v4 = vld [vmem:[#allocation5 + $0x48] sm:$0xff]   ;;  %s1293_s8 = smov [#allocation8]  }
  0x38   :  { %v1104_v1 = vld [vmem:[#allocation5 + $0xc0] sm:$0xff]   ;;  %1006 = vmatprep.subr.bf16.mxu0 %v1103_v0  ;;  %v1108_v5 = vld [vmem:[#allocation5 + $0xc8] sm:$0xff]   ;;  %v1111_v8 = vld [vmem:[#allocation5 + $0x50] sm:$0xff]   ;;  %s915_s9 = sshll.u32 %s1293_s8, 4  ;;  %s916_s9 = int_to_ptr.vmem [resolvable:$true] %s915_s9 }
  0x39   :  { %v1105_v2 = vld [vmem:[#allocation5] sm:$0xff]   ;;  %1028 = vmatprep.subr.bf16.mxu1 %v1104_v1  ;;  %v1109_v6 = vld [vmem:[#allocation5 + $0x8] sm:$0xff]   ;;  %v1112_v9 = vld [vmem:[#allocation5 + $0xd0] sm:$0xff]   ;;  %s1257_s10 = scalar_lea.vmem %s916_s9, 256  ;;  %p1262_p11 = scmp.lt.s32.totalorder %s916_s9, %s916_s9 }
  0x3a   :  { %v1106_v3 = vld [vmem:[#allocation5 + $0x80] sm:$0xff]   ;;  %1007 = vmatpush3.bf16.msra.mxu0 %v1105_v2  ;;  %v1110_v7 = vld [vmem:[#allocation5 + $0x88] sm:$0xff]   ;;  %v1113_v10 = vld [vmem:[#allocation5 + $0x10] sm:$0xff]   ;;  %p1258_p10 = scmp.ne.s32.totalorder %s916_s9, %s1257_s10  ;;  %p1263_p12 = scmp.lt.s32.totalorder %s1257_s10, %s1257_s10 }
  0x3b   :  { %1029 = vmatpush3.bf16.msra.mxu1 %v1106_v3  ;;  %1008 = vmatprep.subr.bf16.mxu0 %v1107_v4  ;;  %v1114_v11 = vld [vmem:[#allocation5 + $0x90] sm:$0xff]   ;;  %v1115_v12 = vld [vmem:[#allocation5 + $0x58] sm:$0xff]   ;;  %v1119_v16 = vld [vmem:[#allocation5 + $0x60] sm:$0xff]  }
  0x3c   :  { %1030 = vmatprep.subr.bf16.mxu1 %v1108_v5  ;;  %v1116_v13 = vld [vmem:[#allocation5 + $0xd8] sm:$0xff]   ;;  %v1120_v17 = vld [vmem:[#allocation5 + $0xe0] sm:$0xff]   ;;  %v1123_v20 = vld [vmem:[#allocation5 + $0x68] sm:$0xff]   ;;  %p1264_p13 = por %p1263_p12, %p1262_p11 }
  0x3d   :  { %v1117_v14 = vld [vmem:[#allocation5 + $0x18] sm:$0xff]   ;;  %v1121_v18 = vld [vmem:[#allocation5 + $0x20] sm:$0xff]   ;;  %v1124_v21 = vld [vmem:[#allocation5 + $0xe8] sm:$0xff]  }
  0x3e   :  { %1009 = vmatpush3.bf16.msra.mxu0 %v1109_v6  ;;  %v1118_v15 = vld [vmem:[#allocation5 + $0x98] sm:$0xff]   ;;  %v1122_v19 = vld [vmem:[#allocation5 + $0xa0] sm:$0xff]   ;;  %v1125_v22 = vld [vmem:[#allocation5 + $0x28] sm:$0xff]   ;;  %p1265_p0 = pnand %p1264_p13, %p1258_p10 }
  0x3f   :  { %1031 = vmatpush3.bf16.msra.mxu1 %v1110_v7  ;;  %1010 = vmatprep.subr.bf16.mxu0 %v1111_v8  ;;  %v1126_v23 = vld [vmem:[#allocation5 + $0xa8] sm:$0xff]   ;;  %v1127_v24 = vld [vmem:[#allocation5 + $0x70] sm:$0xff]   ;;  %v1131_v28 = vld [vmem:[#allocation5 + $0x78] sm:$0xff]  }
  0x40   :  { %1032 = vmatprep.subr.bf16.mxu1 %v1112_v9  ;;  %v1128_v25 = vld [vmem:[#allocation5 + $0xf0] sm:$0xff]   ;;  %v1132_v29 = vld [vmem:[#allocation5 + $0xf8] sm:$0xff]   ;;  %v62_v32 = vld [vmem:[#allocation2 + $0x8] sm:$0xff] }
  0x41   :  { %v1129_v26 = vld [vmem:[#allocation5 + $0x30] sm:$0xff]   ;;  %v1133_v30 = vld [vmem:[#allocation5 + $0x38] sm:$0xff]   ;;  %v61_v34 = vld [vmem:[#allocation2] sm:$0xff]  ;;  %v70_v35 = vpack.c.bf16 %v62_v32, %v62_v32  ;;  %v1292_v32 = vmov 0  }
  0x42   :  { %1011 = vmatpush3.bf16.msra.mxu0 %v1113_v10  ;;  %v1130_v27 = vld [vmem:[#allocation5 + $0xb0] sm:$0xff]   ;;  %v1134_v31 = vld [vmem:[#allocation5 + $0xb8] sm:$0xff]   ;;  %v69_v37 = vpack.c.bf16 %v61_v34, %v61_v34  ;;  %v1135_v40 = vld [vmem:[#allocation5 + $0x140] sm:$0xff]  }
  0x43   :  { %1033 = vmatpush3.bf16.msra.mxu1 %v1114_v11  ;;  %1012 = vmatprep.subr.bf16.mxu0 %v1115_v12  ;;  %v64_v33 = vld [vmem:[#allocation2 + $0x18] sm:$0xff]  ;;  %v63_v38 = vld [vmem:[#allocation2 + $0x10] sm:$0xff]  ;;  %v1136_v41 = vld [vmem:[#allocation5 + $0x1c0] sm:$0xff]  }
  0x44   :  { %1034 = vmatprep.subr.bf16.mxu1 %v1116_v13  ;;  %v72_v36 = vpack.c.bf16 %v64_v33, %v64_v33  ;;  %v71_v39 = vpack.c.bf16 %v63_v38, %v63_v38  ;;  %628 = vmatprep.mubr.bf16.mxu0 %v70_v35  ;;  %v1137_v42 = vld [vmem:[#allocation5 + $0x100] sm:$0xff]   ;;  %v1139_v44 = vld [vmem:[#allocation5 + $0x148] sm:$0xff]   ;;  %v1143_v48 = vld [vmem:[#allocation5 + $0x150] sm:$0xff]  }
  0x45   :  { %v1138_v43 = vld [vmem:[#allocation5 + $0x180] sm:$0xff]   ;;  %v1140_v45 = vld [vmem:[#allocation5 + $0x1c8] sm:$0xff]   ;;  %v1144_v49 = vld [vmem:[#allocation5 + $0x1d0] sm:$0xff]  }
  0x46   :  { %1013 = vmatpush3.bf16.msra.mxu0 %v1117_v14  ;;  %668 = vmatprep.mubr.bf16.mxu1 %v72_v36  ;;  %v1141_v46 = vld [vmem:[#allocation5 + $0x108] sm:$0xff]   ;;  %v1145_v50 = vld [vmem:[#allocation5 + $0x110] sm:$0xff]   ;;  %v1147_v52 = vld [vmem:[#allocation5 + $0x158] sm:$0xff]  }
  0x47   :  { %1035 = vmatpush3.bf16.msra.mxu1 %v1118_v15  ;;  %1014 = vmatprep.subr.bf16.mxu0 %v1119_v16  ;;  %v1142_v47 = vld [vmem:[#allocation5 + $0x188] sm:$0xff]   ;;  %v1146_v51 = vld [vmem:[#allocation5 + $0x190] sm:$0xff]   ;;  %v1148_v53 = vld [vmem:[#allocation5 + $0x1d8] sm:$0xff]  }
  0x48   :  { %1036 = vmatprep.subr.bf16.mxu1 %v1120_v17  ;;  %v1149_v54 = vld [vmem:[#allocation5 + $0x118] sm:$0xff]   ;;  %v1151_v56 = vld [vmem:[#allocation5 + $0x160] sm:$0xff]   ;;  %v1155_v60 = vld [vmem:[#allocation5 + $0x168] sm:$0xff]  }
  0x49   :  { %v1150_v55 = vld [vmem:[#allocation5 + $0x198] sm:$0xff]   ;;  %v1152_v57 = vld [vmem:[#allocation5 + $0x1e0] sm:$0xff]   ;;  %v1156_v61 = vld [vmem:[#allocation5 + $0x1e8] sm:$0xff]  }
  0x4a   :  { %1015 = vmatpush3.bf16.msra.mxu0 %v1121_v18  ;;  %v1153_v58 = vld [vmem:[#allocation5 + $0x120] sm:$0xff]   ;;  %v1157_v62 = vld [vmem:[#allocation5 + $0x128] sm:$0xff]   ;;  %v1159_v0 = vld [vmem:[#allocation5 + $0x170] sm:$0xff]  }
  0x4b   :  { %1037 = vmatpush3.bf16.msra.mxu1 %v1122_v19  ;;  %1016 = vmatprep.subr.bf16.mxu0 %v1123_v20  ;;  %v1154_v59 = vld [vmem:[#allocation5 + $0x1a0] sm:$0xff]   ;;  %v1158_v63 = vld [vmem:[#allocation5 + $0x1a8] sm:$0xff]   ;;  %v1160_v1 = vld [vmem:[#allocation5 + $0x1f0] sm:$0xff]  }
  0x4c   :  { %1038 = vmatprep.subr.bf16.mxu1 %v1124_v21  ;;  %v1161_v2 = vld [vmem:[#allocation5 + $0x130] sm:$0xff]   ;;  %v1163_v4 = vld [vmem:[#allocation5 + $0x178] sm:$0xff]   ;;  %v66_v8 = vld [vmem:[#allocation2 + $0x28] sm:$0xff] }
  0x4d   :  { %v1162_v3 = vld [vmem:[#allocation5 + $0x1b0] sm:$0xff]   ;;  %v1164_v5 = vld [vmem:[#allocation5 + $0x1f8] sm:$0xff]   ;;  %v74_v10 = vpack.c.bf16 %v66_v8, %v66_v8  ;;  %v65_v12 = vld [vmem:[#allocation2 + $0x20] sm:$0xff] }
  0x4e   :  { %1017 = vmatpush3.bf16.msra.mxu0 %v1125_v22  ;;  %v1165_v6 = vld [vmem:[#allocation5 + $0x138] sm:$0xff]   ;;  %v67_v13 = vld [vmem:[#allocation2 + $0x30] sm:$0xff]  ;;  %v73_v14 = vpack.c.bf16 %v65_v12, %v65_v12  ;;  %v1167_v16 = vld [vmem:[#allocation7] ss:$8 sps:$4 sm:$0xff]  }
  0x4f   :  { %1039 = vmatpush3.bf16.msra.mxu1 %v1126_v23  ;;  %1018 = vmatprep.subr.bf16.mxu0 %v1127_v24  ;;  %v1166_v7 = vld [vmem:[#allocation5 + $0x1b8] sm:$0xff]   ;;  %v75_v15 = vpack.c.bf16 %v67_v13, %v67_v13  ;;  %v1169_v17 = vld [vmem:[#allocation7 + $0x4] ss:$8 sps:$4 sm:$0xff]   ;;  %v1173_v21 = vld [vmem:[#allocation7 + $0x20] ss:$8 sps:$4 sm:$0xff]  }
  0x50   :  { %1040 = vmatprep.subr.bf16.mxu1 %v1128_v25  ;;  %v68_v9 = vld [vmem:[#allocation2 + $0x38] sm:$0xff]  ;;  %v1175_v20 = vld [vmem:[#allocation7 + $0x24] ss:$8 sps:$4 sm:$0xff]   ;;  %v1179_v25 = vld [vmem:[#allocation7 + $0x40] ss:$8 sps:$4 sm:$0xff]  }
  0x51   :  { %v76_v11 = vpack.c.bf16 %v68_v9, %v68_v9  ;;  %v1172_v18 = vld [vmem:[#allocation7 + $0x14] ss:$8 sps:$4 sm:$0xff]   ;;  %v1170_v19 = vld [vmem:[#allocation7 + $0x10] ss:$8 sps:$4 sm:$0xff]   ;;  %v1181_v24 = vld [vmem:[#allocation7 + $0x44] ss:$8 sps:$4 sm:$0xff]  }
  0x52   :  { %1019 = vmatpush3.bf16.msra.mxu0 %v1129_v26  ;;  %v1178_v22 = vld [vmem:[#allocation7 + $0x34] ss:$8 sps:$4 sm:$0xff]   ;;  %v1176_v23 = vld [vmem:[#allocation7 + $0x30] ss:$8 sps:$4 sm:$0xff]   ;;  %v925_v35 = vld [vmem:[%s1380_s2] ss:$0 sm:$0xff] }
  0x53   :  { %1041 = vmatpush3.bf16.msra.mxu1 %v1130_v27  ;;  %1020 = vmatprep.subr.bf16.mxu0 %v1131_v28  ;;  %v1184_v26 = vld [vmem:[#allocation7 + $0x54] ss:$8 sps:$4 sm:$0xff]   ;;  %v1182_v27 = vld [vmem:[#allocation7 + $0x50] ss:$8 sps:$4 sm:$0xff]   ;;  %v1187_v28 = vld [vmem:[#allocation7 + $0x64] ss:$8 sps:$4 sm:$0xff]  }
  0x54   :  { %1042 = vmatprep.subr.bf16.mxu1 %v1132_v29  ;;  %v1185_v29 = vld [vmem:[#allocation7 + $0x60] ss:$8 sps:$4 sm:$0xff]  }
  0x56   :  { %1021 = vmatpush3.bf16.msra.mxu0 %v1133_v30  ;;  %v1190_v30 = vld [vmem:[#allocation7 + $0x74] ss:$8 sps:$4 sm:$0xff]  }
  0x57   :  { %1043 = vmatpush3.bf16.msra.mxu1 %v1134_v31  ;;  %1050 = vmatprep.subr.bf16.mxu0 %v1135_v40  ;;  %v1188_v31 = vld [vmem:[#allocation7 + $0x70] ss:$8 sps:$4 sm:$0xff]  }
  0x58   :  { %1072 = vmatprep.subr.bf16.mxu1 %v1136_v41 }
  0x59   :  { %629 = vmatmul.mubr.bf16.vlgmr.msra.gmra.mrb[0].mxu0 %v69_v37 }
  0x5a   :  { %669 = vmatmul.mubr.bf16.vlgmr.msra.gmra.mrb[0].mxu1 %v71_v39  ;;  %1051 = vmatpush3.bf16.msra.mxu0 %v1137_v42 }
  0x5b   :  { %1073 = vmatpush3.bf16.msra.mxu1 %v1138_v43  ;;  %1052 = vmatprep.subr.bf16.mxu0 %v1139_v44 }
  0x5c   :  { %1074 = vmatprep.subr.bf16.mxu1 %v1140_v45  ;;  %708 = vmatprep.mubr.bf16.mxu0 %v74_v10 }
  0x5d   :  { %748 = vmatprep.mubr.bf16.mxu1 %v76_v11 }
  0x5e   :  { %1053 = vmatpush3.bf16.msra.mxu0 %v1141_v46 }
  0x5f   :  { %1075 = vmatpush3.bf16.msra.mxu1 %v1142_v47  ;;  %1054 = vmatprep.subr.bf16.mxu0 %v1143_v48 }
  0x60   :  { %1076 = vmatprep.subr.bf16.mxu1 %v1144_v49 }
  0x62   :  { %1055 = vmatpush3.bf16.msra.mxu0 %v1145_v50 }
  0x63   :  { %1077 = vmatpush3.bf16.msra.mxu1 %v1146_v51  ;;  %1056 = vmatprep.subr.bf16.mxu0 %v1147_v52 }
  0x64   :  { %1078 = vmatprep.subr.bf16.mxu1 %v1148_v53 }
  0x66   :  { %1057 = vmatpush3.bf16.msra.mxu0 %v1149_v54 }
  0x67   :  { %1079 = vmatpush3.bf16.msra.mxu1 %v1150_v55  ;;  %1058 = vmatprep.subr.bf16.mxu0 %v1151_v56 }
  0x68   :  { %1080 = vmatprep.subr.bf16.mxu1 %v1152_v57 }
  0x6a   :  { %1059 = vmatpush3.bf16.msra.mxu0 %v1153_v58 }
  0x6b   :  { %1081 = vmatpush3.bf16.msra.mxu1 %v1154_v59  ;;  %1060 = vmatprep.subr.bf16.mxu0 %v1155_v60  ;;  %v776_v60 = vlaneseq }
  0x6c   :  { %1082 = vmatprep.subr.bf16.mxu1 %v1156_v61 }
  0x6d   :  { %v777_v61 = vshrl.u32 %v776_v60, 7 }
  0x6e   :  { %1061 = vmatpush3.bf16.msra.mxu0 %v1157_v62 }
  0x6f   :  { %1083 = vmatpush3.bf16.msra.mxu1 %v1158_v63  ;;  %1062 = vmatprep.subr.bf16.mxu0 %v1159_v0  ;;  %v778_v62 = vsub.s32 0, %v777_v61  ;;  %v774_v63 = vld [vmem:[%s1382_s4] sm:$0x3]  ;;  %v782_v0 = vsub.s32 1, %v777_v61 }
  0x70   :  { %1084 = vmatprep.subr.bf16.mxu1 %v1160_v1 }
  0x71   :  { %v779_v1 = vrot.slane %v774_v63, %v778_v62 }
  0x72   :  { %1063 = vmatpush3.bf16.msra.mxu0 %v1161_v2  ;;  %v783_v2 = vrot.slane %v774_v63, %v782_v0 }
  0x73   :  { %1085 = vmatpush3.bf16.msra.mxu1 %v1162_v3  ;;  %1064 = vmatprep.subr.bf16.mxu0 %v1163_v4 }
  0x74   :  { %1086 = vmatprep.subr.bf16.mxu1 %v1164_v5 }
  0x76   :  { %1065 = vmatpush3.bf16.msra.mxu0 %v1165_v6 }
  0x77   :  { %1087 = vmatpush3.bf16.msra.mxu1 %v1166_v7  ;;  %866 = vmatprep.subr.bf16.mxu0 %v1169_v17 }
  0x79   :  { %709 = vmatmul.mubr.bf16.vlgmr.msra.gmra.mrb[4].mxu0 %v73_v14 }
  0x7a   :  { %749 = vmatmul.mubr.bf16.vlgmr.msra.gmra.mrb[4].mxu1 %v75_v15  ;;  %867 = vmatpush1.bf16.msra.mxu0 %v1167_v16 }
  0x7b   :  { %868 = vmatprep.subr.bf16.mxu0 %v1172_v18  ;;  %898 = vmatprep.mubr.bf16.mxu0 %v1292_v32 }
  0x7e   :  { %869 = vmatpush1.bf16.msra.mxu0 %v1170_v19 }
  0x7f   :  { %870 = vmatprep.subr.bf16.mxu0 %v1175_v20 }
  0x82   :  { %871 = vmatpush1.bf16.msra.mxu0 %v1173_v21 }
  0x83   :  { %872 = vmatprep.subr.bf16.mxu0 %v1178_v22 }
  0x86   :  { %873 = vmatpush1.bf16.msra.mxu0 %v1176_v23 }
  0x87   :  { %874 = vmatprep.subr.bf16.mxu0 %v1181_v24 }
  0x8a   :  { %875 = vmatpush1.bf16.msra.mxu0 %v1179_v25 }
  0x8b   :  { %876 = vmatprep.subr.bf16.mxu0 %v1184_v26 }
  0x8e   :  { %877 = vmatpush1.bf16.msra.mxu0 %v1182_v27 }
  0x8f   :  { %878 = vmatprep.subr.bf16.mxu0 %v1187_v28 }
  0x92   :  { %879 = vmatpush1.bf16.msra.mxu0 %v1185_v29 }
  0x93   :  { %880 = vmatprep.subr.bf16.mxu0 %v1190_v30 }
  0x96   :  { %881 = vmatpush1.bf16.msra.mxu0 %v1188_v31 }
 0x12c   :  { %v1022_v33 = vpop.f32.mrb[0].mxu0 }
 0x12d   :  { %v1044_v34 = vpop.f32.mrb[0].mxu1  ;;  %v1023_v36 = vpop.f32.mrb[1].mxu0 }
 0x12e   :  { %v1045_v37 = vpop.f32.mrb[1].mxu1  ;;  %v1024_v38 = vadd.f32 %v1023_v36, %v1022_v33  ;;  %v1025_v40 = vpop.f32.mrb[2].mxu0 }
 0x12f   :  { %v1046_v39 = vadd.f32 %v1045_v37, %v1044_v34  ;;  %v1047_v41 = vpop.f32.mrb[2].mxu1  ;;  %v1026_v42 = vpop.f32.mrb[3].mxu0 }
 0x130   :  { %v1048_v43 = vpop.f32.mrb[3].mxu1  ;;  %v631_v44 = vadd.f32 %v1024_v38, %v925_v35 }
 0x132   :  { %v671_v45 = vadd.f32 %v1046_v39, %v631_v44 }
 0x14c   :  { %v1066_v46 = vpop.f32.mrb[4].mxu0 }
 0x14d   :  { %v1088_v47 = vpop.f32.mrb[4].mxu1  ;;  %v1067_v48 = vpop.f32.mrb[5].mxu0 }
 0x14e   :  { %v1068_v49 = vadd.f32 %v1067_v48, %v1066_v46  ;;  %v1089_v50 = vpop.f32.mrb[5].mxu1  ;;  %v1069_v51 = vpop.f32.mrb[6].mxu0 }
 0x14f   :  { %v1090_v52 = vadd.f32 %v1089_v50, %v1088_v47  ;;  %v1091_v53 = vpop.f32.mrb[6].mxu1  ;;  %v1070_v54 = vpop.f32.mrb[7].mxu0 }
 0x150   :  { %v711_v55 = vadd.f32 %v1068_v49, %v671_v45  ;;  %v1092_v56 = vpop.f32.mrb[7].mxu1 }
 0x152   :  { %v751_v57 = vadd.f32 %v1090_v52, %v711_v55 }
 0x154   :  { %v756_v58 = vmax.f32 %v751_v57, 0.0 }
 0x156   :  { %v757_v59 = vpack.c.bf16 %v756_v58, %v756_v58 }
 0x158   :  { %899 = vmatmul.mubr.bf16.vlgmr.msra.gmra.mrb[8].mxu0 %v757_v59 }
 0x22b   :  { %v900_v3 = vpop.f32.mrb[8].mxu0 }
 0x22c   :  { %v901_v4 = vadd.f32 %v900_v3, %v779_v1  ;;  %v902_v5 = vpop.f32.mrb[9].mxu0 }
 0x22d   :  { %v903_v6 = vadd.f32 %v902_v5, %v783_v2  ;;  %v904_v7 = vpop.f32.mrb[10].mxu0 }
 0x22e   :  { %907 = vst [vmem:[#allocation8] sm:$0xff] %v901_v4  ;;  %v905_v8 = vpop.f32.mrb[11].mxu0 }
 0x22f   :  { %908 = vst [vmem:[#allocation8 + $0x8] sm:$0xff] %v903_v6 }
 0x230   :  { %1268 = shalt.err (!%p1265_p0)
}
 0x231   :  { %s1269_s12 = scalar_lea.hbm %s1383_s5, 256 }
 0x232   :  { %p1270_p1 = scmp.ne.s32.totalorder %s1383_s5, %s1269_s12  ;;  %p1273_p2 = scmp.lt.u32.totalorder %s1269_s12, %s1383_s5 }
 0x234   :  { %p1275_p3 = pnand %p1273_p2, %p1270_p1 }
 0x236   :  { %1278 = shalt.err (!%p1275_p3)
}
 0x237   :  { %918 = dma.vmem_to_hbm [thread:$0]  %s916_s9, 256, %s1383_s5, [#allocation4]  }
 0x238   :  { %1283 = dma.done.wait [#allocation4], 256  }
 0x239   :  { %1284 = vsyncadd [#allocation4], 4294967040 }
 0x23a   :  { %922 = vsyncpa [#allocation3], 1 }
 0x23b   :  { %923 = vsyncpa [#allocation6], 1 }
 0x23c   :  { %924 = vsyncpa [#allocation4], 1 }

</bundles_post_ra>
